<compile_context>
chip_gen: v7x
topology: tpu7x:2x2x1
jax: 0.10.0
libtpu: 0.0.40
codegen_flags: <defaults>
</compile_context>

<pallas_src>
import math
from functools import partial

import numpy as np
import jax
import jax.numpy as jnp
from jax.experimental import pallas as pl
from jax.experimental.pallas import tpu as pltpu

EPS = 1e-5  # nn.LayerNorm default


# ----------------------------------------------------------------------------
# in-kernel helpers (also used by the pure-JAX reference)
# ----------------------------------------------------------------------------
def _layernorm(x, w, b):
    mu = jnp.mean(x, axis=-1, keepdims=True)
    var = jnp.mean((x - mu) ** 2, axis=-1, keepdims=True)
    return (x - mu) * jax.lax.rsqrt(var + EPS) * w + b


def _gelu_erf(x):
    # exact GELU (PyTorch nn.GELU default)
    return 0.5 * x * (1.0 + jax.lax.erf(x * 0.7071067811865476))


# ----------------------------------------------------------------------------
# Pallas kernels
# ----------------------------------------------------------------------------
def embed_kernel(x_ref, w_ref, b_ref, pos_ref, o_ref):
    # predictor_embed Linear fused with the (already gathered) pos-embed add
    # x: (T, E) f32, w: (E, pD) bf16, b: (1, pD) f32, pos: (T, pD) f32
    xb = x_ref[...].astype(jnp.bfloat16)
    y = jnp.dot(xb, w_ref[...], preferred_element_type=jnp.float32)
    o_ref[...] = y + b_ref[...] + pos_ref[...]


def ln_proj_kernel(x_ref, gw_ref, gb_ref, w_ref, b_ref, o_ref):
    # final LayerNorm fused with predictor_porj Linear
    xn = _layernorm(x_ref[...], gw_ref[...], gb_ref[...])
    o_ref[...] = (
        jnp.dot(xn.astype(jnp.bfloat16), w_ref[...],
                preferred_element_type=jnp.float32)
        + b_ref[...]
    )


def block_kernel(
    x_ref,
    ln1w, ln1b, qkvw, qkvb, projw, projb,
    ln2w, ln2b, fc1w, fc1b, fc2w, fc2b,
    o_ref,
    *, num_heads, head_dim,
):
    x = x_ref[0]                      # (N, D) f32 residual stream
    N = x.shape[0]
    D = num_heads * head_dim
    scale = head_dim ** -0.5

    # ---- attention branch --------------------------------------------------
    xn = _layernorm(x, ln1w[...], ln1b[...]).astype(jnp.bfloat16)
    qkv = jnp.dot(xn, qkvw[...], preferred_element_type=jnp.float32) + qkvb[...]
    q = qkv[:, 0:D] * scale           # fold 1/sqrt(hd) into q (cheaper than on s)
    k = qkv[:, D:2 * D]
    v = qkv[:, 2 * D:3 * D]

    acc = jnp.zeros((N, D), jnp.float32)
    for h in range(num_heads):        # static unrolled loop, no concat / no .T
        sl = slice(h * head_dim, (h + 1) * head_dim)
        qh = q[:, sl].astype(jnp.bfloat16)
        kh = k[:, sl].astype(jnp.bfloat16)
        vh = v[:, sl].astype(jnp.bfloat16)
        # trans-B matmul: contract the last dims directly (no XLU transpose)
        s = jax.lax.dot_general(qh, kh, (((1,), (1,)), ((), ())),
                                preferred_element_type=jnp.float32)   # (N, N)
        s = s - jnp.max(s, axis=-1, keepdims=True)
        p = jnp.exp(s)
        inv = pl.reciprocal(jnp.sum(p, axis=-1, keepdims=True), approx=True)
        p = p * inv
        oh = jnp.dot(p.astype(jnp.bfloat16), vh,
                     preferred_element_type=jnp.float32)              # (N, hd)
        # accumulate directly into the output projection
        acc = acc + jnp.dot(oh.astype(jnp.bfloat16), projw[sl, :],
                            preferred_element_type=jnp.float32)       # (N, D)
    x = x + acc + projb[...]

    # ---- MLP branch ----------------------------------------------------------
    xn2 = _layernorm(x, ln2w[...], ln2b[...]).astype(jnp.bfloat16)
    h1 = jnp.dot(xn2, fc1w[...], preferred_element_type=jnp.float32) + fc1b[...]
    h1 = _gelu_erf(h1).astype(jnp.bfloat16)
    y = jnp.dot(h1, fc2w[...], preferred_element_type=jnp.float32) + fc2b[...]
    o_ref[0] = x + y


# ----------------------------------------------------------------------------
# Pallas wrappers
# ----------------------------------------------------------------------------
_MAX_ROW_TILE = 256   # ~85% of HBM roofline for the mem-bound row kernels


def _row_tile(rows):
    return rows if rows <= _MAX_ROW_TILE else _MAX_ROW_TILE


def _pad_rows(a, padded_rows):
    rows = a.shape[0]
    if padded_rows == rows:
        return a
    return jnp.pad(a, ((0, padded_rows - rows), (0, 0)))


def embed_call(x2, w, b, pos2):
    rows, K = x2.shape
    D = w.shape[1]
    T = _row_tile(rows)
    padded = pl.cdiv(rows, T) * T
    out = pl.pallas_call(
        embed_kernel,
        out_shape=jax.ShapeDtypeStruct((padded, D), jnp.float32),
        grid=(padded // T,),
        in_specs=[pl.BlockSpec((T, K), lambda i: (i, 0)),
                  pl.BlockSpec((K, D), lambda i: (0, 0)),
                  pl.BlockSpec((1, D), lambda i: (0, 0)),
                  pl.BlockSpec((T, D), lambda i: (i, 0))],
        out_specs=pl.BlockSpec((T, D), lambda i: (i, 0)),
        compiler_params=pltpu.CompilerParams(
            dimension_semantics=("parallel",)),
    )(_pad_rows(x2, padded), w, b, _pad_rows(pos2, padded))
    return out[:rows]


def ln_proj_call(x2, gw, gb, w, b):
    rows, K = x2.shape
    D = w.shape[1]
    T = _row_tile(rows)
    padded = pl.cdiv(rows, T) * T
    out = pl.pallas_call(
        ln_proj_kernel,
        out_shape=jax.ShapeDtypeStruct((padded, D), jnp.float32),
        grid=(padded // T,),
        in_specs=[pl.BlockSpec((T, K), lambda i: (i, 0)),
                  pl.BlockSpec((1, K), lambda i: (0, 0)),
                  pl.BlockSpec((1, K), lambda i: (0, 0)),
                  pl.BlockSpec((K, D), lambda i: (0, 0)),
                  pl.BlockSpec((1, D), lambda i: (0, 0))],
        out_specs=pl.BlockSpec((T, D), lambda i: (i, 0)),
        compiler_params=pltpu.CompilerParams(
            dimension_semantics=("parallel",)),
    )(_pad_rows(x2, padded), gw, gb, w, b)
    return out[:rows]


def vit_block_call(x, blk, num_heads):
    Bt, N, D = x.shape
    head_dim = D // num_heads
    kern = partial(block_kernel, num_heads=num_heads, head_dim=head_dim)
    wspecs = [pl.BlockSpec(tuple(w.shape), lambda b: (0, 0)) for w in blk]

    # size the scoped VMEM request from the actual buffers (bf16 weights keep
    # this well under the 64 MiB physical VMEM of v7x at real ViT sizes)
    wbytes = sum(int(np.prod(w.shape)) * w.dtype.itemsize for w in blk)
    xbytes = N * D * 4
    vmem_limit = int(min(60 * 2**20,
                         max(32 * 2**20, 2 * wbytes + 8 * xbytes + (4 << 20))))

    return pl.pallas_call(
        kern,
        out_shape=jax.ShapeDtypeStruct((Bt, N, D), jnp.float32),
        grid=(Bt,),
        in_specs=[pl.BlockSpec((1, N, D), lambda b: (b, 0, 0))] + wspecs,
        out_specs=pl.BlockSpec((1, N, D), lambda b: (b, 0, 0)),
        compiler_params=pltpu.CompilerParams(
            dimension_semantics=("parallel",),      # megacore split on v7x
            vmem_limit_bytes=vmem_limit),
    )(x, *blk)


# ----------------------------------------------------------------------------
# mask utilities (plain-JAX glue, matching the PyTorch helpers)
# ----------------------------------------------------------------------------
def apply_masks_jax(x, masks):
    # x: (B, N, D); masks: list of (B, K) int index arrays
    B, _, D = x.shape
    outs = []
    for m in masks:
        idx = jnp.broadcast_to(m[:, :, None], (B, m.shape[1], D))
        outs.append(jnp.take_along_axis(x, idx, axis=1))
    return jnp.concatenate(outs, axis=0)


def repeat_interleave_batch_jax(x, B, repeat):
    N = x.shape[0] // B
    chunks = []
    for i in range(N):
        blk = x[i * B:(i + 1) * B]
        chunks.extend([blk] * repeat)
    return jnp.concatenate(chunks, axis=0)


# ----------------------------------------------------------------------------
# parameter construction (deterministic, synthetic)
# ----------------------------------------------------------------------------
def trunc_normal(key, shape, std=0.02):
    return std * jax.random.truncated_normal(key, -2.0, 2.0, shape, jnp.float32)


def sinus_pos_embedding(embed_dim, grid_size):
    def get_1d(dim, pos):
        omega = np.arange(dim // 2, dtype=np.float64)
        omega /= dim / 2.0
        omega = 1.0 / 10000.0 ** omega
        out = np.einsum("m,d->md", pos.reshape(-1), omega)
        return np.concatenate([np.sin(out), np.cos(out)], axis=1)

    gw, gh = np.meshgrid(
        np.arange(grid_size, dtype=np.float64),
        np.arange(grid_size, dtype=np.float64),
    )
    emb_h = get_1d(embed_dim // 2, gh)
    emb_w = get_1d(embed_dim // 2, gw)
    return np.concatenate([emb_h, emb_w], axis=1)  # (grid_size**2, embed_dim)


def init_params(key, *, num_patches, embed_dim, pred_embed_dim, depth,
                num_heads, mlp_ratio=4.0, init_std=0.02):
    pD = pred_embed_dim
    Hm = int(pD * mlp_ratio)
    grid_size = int(num_patches ** 0.5)
    bf16 = jnp.bfloat16

    key, ke, km = jax.random.split(key, 3)
    params = {
        "num_heads": num_heads,
        # predictor_embed : Linear(embed_dim -> pred_embed_dim)
        "embed_w": trunc_normal(ke, (pD, embed_dim), init_std).T.astype(bf16),
        "embed_b": jnp.zeros((1, pD), jnp.float32),
        "mask_token": trunc_normal(km, (1, 1, pD), init_std),
        "pos_embed": jnp.asarray(
            sinus_pos_embedding(pD, grid_size), jnp.float32)[None, :, :],
        "norm_w": jnp.ones((1, pD), jnp.float32),
        "norm_b": jnp.zeros((1, pD), jnp.float32),
        "blocks": [],
    }

    for i in range(depth):
        key, k1, k2, k3, k4 = jax.random.split(key, 5)
        rescale = 1.0 / math.sqrt(2.0 * (i + 1))      # fix_init_weight
        blk = [
            jnp.ones((1, pD), jnp.float32),                        # ln1 w
            jnp.zeros((1, pD), jnp.float32),                       # ln1 b
            trunc_normal(k1, (3 * pD, pD), init_std).T.astype(bf16),  # qkv w (pD,3pD)
            jnp.zeros((1, 3 * pD), jnp.float32),                   # qkv b
            (trunc_normal(k2, (pD, pD), init_std) * rescale).T.astype(bf16),  # proj w
            jnp.zeros((1, pD), jnp.float32),                       # proj b
            jnp.ones((1, pD), jnp.float32),                        # ln2 w
            jnp.zeros((1, pD), jnp.float32),                       # ln2 b
            trunc_normal(k3, (Hm, pD), init_std).T.astype(bf16),   # fc1 w (pD,Hm)
            jnp.zeros((1, Hm), jnp.float32),                       # fc1 b
            (trunc_normal(k4, (pD, Hm), init_std) * rescale).T.astype(bf16),  # fc2 w
            jnp.zeros((1, pD), jnp.float32),                       # fc2 b
        ]
        params["blocks"].append(blk)

    key, kp = jax.random.split(key)
    # predictor_porj : Linear(pred_embed_dim -> embed_dim)
    params["proj_w"] = trunc_normal(kp, (embed_dim, pD), init_std).T.astype(bf16)
    params["proj_b"] = jnp.zeros((1, embed_dim), jnp.float32)
    return params


# ----------------------------------------------------------------------------
# forward pass (Pallas) and pure-JAX reference
# ----------------------------------------------------------------------------
def predictor_forward(x, masks_x, masks, params):
    nmx, nm = len(masks_x), len(masks)
    Bx, Nctx, E = x.shape
    B = Bx // nmx
    pD = params["pos_embed"].shape[-1]
    Eout = params["proj_w"].shape[1]

    pos = jnp.broadcast_to(params["pos_embed"],
                           (B,) + params["pos_embed"].shape[1:])

    # 1. predictor_embed fused with the masked pos-embed add
    pos_ctx = apply_masks_jax(pos, masks_x)                      # (Bx, Nctx, pD)
    tok = embed_call(x.reshape(Bx * Nctx, E),
                     params["embed_w"], params["embed_b"],
                     pos_ctx.reshape(Bx * Nctx, pD)).reshape(Bx, Nctx, pD)

    # 2. mask tokens at the target positions
    pos_tgt = apply_masks_jax(pos, masks)                        # (B*nm, Npred, pD)
    pos_tgt = repeat_interleave_batch_jax(pos_tgt, B, repeat=nmx)
    pred_tokens = params["mask_token"] + pos_tgt                 # (B*nm*nmx, Npred, pD)

    # 3. concat context tokens with mask tokens
    z = jnp.concatenate([jnp.tile(tok, (nm, 1, 1)), pred_tokens], axis=1)

    # 4. transformer blocks (fused Pallas kernel per block)
    for blk in params["blocks"]:
        z = vit_block_call(z, blk, params["num_heads"])

    # 5. slice predicted tokens, then fused LayerNorm + output projection
    #    (LN is per-token, so slicing before the norm is exact)
    zp = z[:, Nctx:, :]
    Bt, Npred, _ = zp.shape
    out = ln_proj_call(zp.reshape(Bt * Npred, pD),
                       params["norm_w"], params["norm_b"],
                       params["proj_w"], params["proj_b"])
    return out.reshape(Bt, Npred, Eout)


def _mm(a, w):
    # bf16 MXU-style matmul with f32 accumulation (matches in-kernel math)
    dn = (((a.ndim - 1,), (0,)), ((), ()))
    return jax.lax.dot_general(a.astype(jnp.bfloat16), w.astype(jnp.bfloat16),
                               dn, preferred_element_type=jnp.float32)


def predictor_forward_ref(x, masks_x, masks, params):
    nmx, nm = len(masks_x), len(masks)
    Bx, Nctx, E = x.shape
    B = Bx // nmx
    pD = params["pos_embed"].shape[-1]
    nh = params["num_heads"]
    hd = pD // nh

    pos = jnp.broadcast_to(params["pos_embed"],
                           (B,) + params["pos_embed"].shape[1:])

    t = _mm(x, params["embed_w"]) + params["embed_b"]
    t = t + apply_masks_jax(pos, masks_x)

    pos_tgt = repeat_interleave_batch_jax(apply_masks_jax(pos, masks), B, nmx)
    pred_tokens = params["mask_token"] + pos_tgt
    z = jnp.concatenate([jnp.tile(t, (nm, 1, 1)), pred_tokens], axis=1)

    for (ln1w, ln1b, qkvw, qkvb, projw, projb,
         ln2w, ln2b, fc1w, fc1b, fc2w, fc2b) in params["blocks"]:
        Bt, N, _ = z.shape
        xn = _layernorm(z, ln1w, ln1b)
        qkv = _mm(xn, qkvw) + qkvb
        q, k, v = qkv[..., :pD], qkv[..., pD:2 * pD], qkv[..., 2 * pD:]
        q = q.reshape(Bt, N, nh, hd).transpose(0, 2, 1, 3) * (hd ** -0.5)
        k = k.reshape(Bt, N, nh, hd).transpose(0, 2, 1, 3)
        v = v.reshape(Bt, N, nh, hd).transpose(0, 2, 1, 3)
        s = jnp.einsum("bhnd,bhmd->bhnm", q.astype(jnp.bfloat16),
                       k.astype(jnp.bfloat16),
                       preferred_element_type=jnp.float32)
        a = jax.nn.softmax(s, axis=-1)
        o = jnp.einsum("bhnm,bhmd->bhnd", a.astype(jnp.bfloat16),
                       v.astype(jnp.bfloat16),
                       preferred_element_type=jnp.float32)
        o = o.transpose(0, 2, 1, 3).reshape(Bt, N, pD)
        z = z + _mm(o, projw) + projb
        xn2 = _layernorm(z, ln2w, ln2b)
        z = z + _mm(_gelu_erf(_mm(xn2, fc1w) + fc1b), fc2w) + fc2b

    z = _layernorm(z, params["norm_w"], params["norm_b"])
    z = z[:, Nctx:]
    return _mm(z, params["proj_w"]) + params["proj_b"]


# ----------------------------------------------------------------------------
if __name__ == "__main__":
    # small config: 16 patches (4x4 grid), embed 64 -> pred 64, 2 blocks, 4 heads
    B, NUM_PATCHES = 2, 16
    EMBED, PRED_D, DEPTH, HEADS, MLP = 64, 64, 2, 4, 4.0
    N_CTX, N_PRED = 8, 4

    key = jax.random.PRNGKey(0)
    key, kx, kp = jax.random.split(key, 3)

    # encoder output for the context tokens: (B * len(masks_x), N_ctxt, embed_dim)
    x = jax.random.normal(kx, (B, N_CTX, EMBED), jnp.float32)

    # deterministic masks (indices into the patch grid)
    masks_x = [jnp.array([[0, 1, 2, 3, 4, 5, 6, 7],
                          [8, 9, 10, 11, 12, 13, 14, 15]], dtype=jnp.int32)]
    masks = [jnp.array([[8, 9, 10, 11], [0, 1, 2, 3]], dtype=jnp.int32),
             jnp.array([[0, 2, 4, 6], [1, 5, 9, 13]], dtype=jnp.int32)]

    params = init_params(kp, num_patches=NUM_PATCHES, embed_dim=EMBED,
                         pred_embed_dim=PRED_D, depth=DEPTH, num_heads=HEADS,
                         mlp_ratio=MLP)

    out = predictor_forward(x, masks_x, masks, params)
    out = jax.block_until_ready(out)

    ref = predictor_forward_ref(x, masks_x, masks, params)
    np.testing.assert_allclose(np.asarray(out), np.asarray(ref),
                               rtol=1e-2, atol=1e-2)
    assert out.shape == (B * len(masks) * len(masks_x), N_PRED, EMBED)

    print("KERNEL_OK")
</pallas_src>

<mosaic_0001>
module attributes {stable_mosaic.version = 11 : i64} {
  func.func @embed_kernel(%arg0: i32, %arg1: memref<16x64xf32, #tpu.memory_space<vmem>>, %arg2: memref<64x64xbf16, #tpu.memory_space<vmem>>, %arg3: memref<1x64xf32, #tpu.memory_space<vmem>>, %arg4: memref<16x64xf32, #tpu.memory_space<vmem>>, %arg5: memref<16x64xf32, #tpu.memory_space<vmem>>) attributes {dimension_semantics = [#tpu.dimension_semantics<parallel>], iteration_bounds = array<i64: 1>, scalar_prefetch = 0 : i64, scratch_operands = 0 : i64, tpu.core_type = #tpu.core_type<tc>, window_params = [{transform_indices = @transform_0, window_bounds = array<i64: 16, 64>}, {pipeline_mode = #tpu.pipeline_mode<synchronous>, transform_indices = @transform_1, window_bounds = array<i64: 64, 64>}, {pipeline_mode = #tpu.pipeline_mode<synchronous>, transform_indices = @transform_2, window_bounds = array<i64: 1, 64>}, {transform_indices = @transform_3, window_bounds = array<i64: 16, 64>}, {transform_indices = @transform_4, window_bounds = array<i64: 16, 64>}]} {
    %c0 = arith.constant 0 : index
    %c0_0 = arith.constant 0 : index
    %0 = vector.load %arg1[%c0, %c0_0] : memref<16x64xf32, #tpu.memory_space<vmem>>, vector<16x64xf32>
    %1 = arith.truncf %0 : vector<16x64xf32> to vector<16x64xbf16>
    %c0_1 = arith.constant 0 : index
    %c0_2 = arith.constant 0 : index
    %2 = vector.load %arg2[%c0_1, %c0_2] : memref<64x64xbf16, #tpu.memory_space<vmem>>, vector<64x64xbf16>
    %cst = arith.constant dense<0.000000e+00> : vector<16x64xf32>
    %3 = tpu.matmul %1, %2, %cst {dimension_numbers = #tpu.dot_dimension_numbers<[1], [0], [0], [1], [0, 0, 1, 1], [], []>} : vector<16x64xbf16>, vector<64x64xbf16>, vector<16x64xf32> -> vector<16x64xf32>
    %c0_3 = arith.constant 0 : index
    %c0_4 = arith.constant 0 : index
    %4 = vector.load %arg3[%c0_3, %c0_4] : memref<1x64xf32, #tpu.memory_space<vmem>>, vector<1x64xf32>
    %5 = vector.broadcast %4 : vector<1x64xf32> to vector<16x64xf32>
    %6 = arith.addf %3, %5 : vector<16x64xf32>
    %c0_5 = arith.constant 0 : index
    %c0_6 = arith.constant 0 : index
    %7 = vector.load %arg4[%c0_5, %c0_6] : memref<16x64xf32, #tpu.memory_space<vmem>>, vector<16x64xf32>
    %8 = arith.addf %6, %7 : vector<16x64xf32>
    %c0_7 = arith.constant 0 : index
    %c0_8 = arith.constant 0 : index
    %9 = vector.load %arg5[%c0_7, %c0_8] : memref<16x64xf32, #tpu.memory_space<vmem>>, vector<16x64xf32>
    tpu.vector_store %arg5[%c0_7, %c0_8], %8 {strides = array<i32>} : memref<16x64xf32, #tpu.memory_space<vmem>>, vector<16x64xf32>,
    return
  }
  func.func @transform_0(%arg0: i32) -> (i32, i32) {
    %c0_i32 = arith.constant 0 : i32
    %c0_i32_0 = arith.constant 0 : i32
    return %arg0, %c0_i32 : i32, i32
  }
  func.func @transform_1(%arg0: i32) -> (i32, i32) {
    %c0_i32 = arith.constant 0 : i32
    %c0_i32_0 = arith.constant 0 : i32
    %c0_i32_1 = arith.constant 0 : i32
    return %c0_i32, %c0_i32_0 : i32, i32
  }
  func.func @transform_2(%arg0: i32) -> (i32, i32) {
    %c0_i32 = arith.constant 0 : i32
    %c0_i32_0 = arith.constant 0 : i32
    %c0_i32_1 = arith.constant 0 : i32
    return %c0_i32, %c0_i32_0 : i32, i32
  }
  func.func @transform_3(%arg0: i32) -> (i32, i32) {
    %c0_i32 = arith.constant 0 : i32
    %c0_i32_0 = arith.constant 0 : i32
    return %arg0, %c0_i32 : i32, i32
  }
  func.func @transform_4(%arg0: i32) -> (i32, i32) {
    %c0_i32 = arith.constant 0 : i32
    %c0_i32_0 = arith.constant 0 : i32
    return %arg0, %c0_i32 : i32, i32
  }
}

</mosaic_0001>

<bundles_post_ra>
// kernel: tpu_custom_call.1
= control target key start
LH: loop header
LB: loop body
LE: loop exit
PB: predicated region body
PF: predicated region fallthrough
CT: control target
= control target key end

     0   :  { %9 = vsyncpa [#allocation3], 0  ;;  %s400_s0 = inlined_call_operand.hbm [shape: f32[16,64], index: 0, kind: input, shape index: {}]   ;;  %s401_s1 = inlined_call_operand.hbm [shape: bf16[64,64], index: 1, kind: input, shape index: {}]   ;;  %s402_s2 = inlined_call_operand.vmem [shape: f32[1,64], index: 2, kind: input, shape index: {}]   ;;  %s403_s3 = inlined_call_operand.hbm [shape: f32[16,64], index: 3, kind: input, shape index: {}]   ;;  %s404_s4 = inlined_call_operand.hbm [shape: f32[16,64], index: 4, kind: output, shape index: {}]  }
   0x1   :  { %10 = vsyncpa [#allocation6], 0 }
   0x2   :  { %11 = vsyncpa [#allocation4], 0  ;;  %s302_s15 = smov [#allocation5]   ;;  %s208_s19 = scalar_lea.hbm %s401_s1, 512 }
   0x3   :  { %s29_s16 = sshll.u32 %s302_s15, 4  ;;  %p209_p0 = scmp.ne.s32.totalorder %s401_s1, %s208_s19  ;;  %s30_s16 = int_to_ptr.vmem [resolvable:$true] %s29_s16 }
   0x4   :  { %p212_p1 = scmp.lt.u32.totalorder %s208_s19, %s401_s1 }
   0x6   :  { %p214_p2 = pnand %p212_p1, %p209_p0 }
   0x8   :  { %217 = shalt.err (!%p214_p2)
}
   0x9   :  { %s218_s24 = scalar_lea.vmem %s30_s16, 512  ;;  %p223_p4 = scmp.lt.s32.totalorder %s30_s16, %s30_s16 }
   0xa   :  { %p219_p3 = scmp.ne.s32.totalorder %s30_s16, %s218_s24  ;;  %p224_p5 = scmp.lt.s32.totalorder %s218_s24, %s218_s24 }
   0xc   :  { %p225_p6 = por %p224_p5, %p223_p4 }
   0xe   :  { %p226_p7 = pnand %p225_p6, %p219_p3 }
  0x10   :  { %229 = shalt.err (!%p226_p7)
}
  0x11   :  { %s303_s25 = smov 64   ;;  %s304_s26 = smov 4  }
  0x12   :  { %35 = dma.hbm_to_vmem [thread:$0]  %s401_s1, 512, %s30_s16, [#allocation6], %s303_s25, %s303_s25, %s304_s26  }
  0x13   :  { %s305_s29 = smov [#allocation2]   ;;  %s230_s7 = scalar_lea.hbm %s400_s0, 256 }
  0x14   :  { %s17_s30 = sshll.u32 %s305_s29, 4  ;;  %p231_p8 = scmp.ne.s32.totalorder %s400_s0, %s230_s7  ;;  %s18_s30 = int_to_ptr.vmem [resolvable:$true] %s17_s30 }
  0x15   :  { %p234_p9 = scmp.lt.u32.totalorder %s230_s7, %s400_s0 }
  0x17   :  { %p236_p10 = pnand %p234_p9, %p231_p8 }
  0x19   :  { %239 = shalt.err (!%p236_p10)
}
  0x1a   :  { %s240_s12 = scalar_lea.vmem %s18_s30, 256  ;;  %p245_p12 = scmp.lt.s32.totalorder %s18_s30, %s18_s30 }
  0x1b   :  { %p241_p11 = scmp.ne.s32.totalorder %s18_s30, %s240_s12  ;;  %p246_p13 = scmp.lt.s32.totalorder %s240_s12, %s240_s12 }
  0x1d   :  { %p247_p0 = por %p246_p13, %p245_p12 }
  0x1f   :  { %p248_p1 = pnand %p247_p0, %p241_p11 }
  0x21   :  { %251 = shalt.err (!%p248_p1)
}
  0x22   :  { %s306_s1 = smov 128   ;;  %s307_s13 = smov 8  }
  0x23   :  { %23 = dma.hbm_to_vmem [thread:$0]  %s400_s0, 256, %s18_s30, [#allocation3], %s306_s1, %s306_s1, %s307_s13  }
  0x24   :  { %s308_s16 = smov [#allocation7]   ;;  %s252_s20 = scalar_lea.hbm %s403_s3, 256 }
  0x25   :  { %s43_s17 = sshll.u32 %s308_s16, 4  ;;  %p253_p2 = scmp.ne.s32.totalorder %s403_s3, %s252_s20  ;;  %s44_s17 = int_to_ptr.vmem [resolvable:$true] %s43_s17 }
  0x26   :  { %p256_p3 = scmp.lt.u32.totalorder %s252_s20, %s403_s3 }
  0x28   :  { %p258_p4 = pnand %p256_p3, %p253_p2 }
  0x2a   :  { %261 = shalt.err (!%p258_p4)
}
  0x2b   :  { %s262_s25 = scalar_lea.vmem %s44_s17, 256  ;;  %p267_p6 = scmp.lt.s32.totalorder %s44_s17, %s44_s17 }
  0x2c   :  { %p263_p5 = scmp.ne.s32.totalorder %s44_s17, %s262_s25  ;;  %p268_p7 = scmp.lt.s32.totalorder %s262_s25, %s262_s25 }
  0x2e   :  { %p269_p8 = por %p268_p7, %p267_p6 }
  0x30   :  { %p270_p9 = pnand %p269_p8, %p263_p5 }
  0x32   :  { %273 = shalt.err (!%p270_p9)
}
  0x33   :  { %49 = dma.hbm_to_vmem [thread:$0]  %s403_s3, 256, %s44_s17, [#allocation6], %s306_s1, %s306_s1, %s307_s13  }
  0x34   :  { %296 = dma.done.wait [#allocation3], 256  }
  0x35   :  { %297 = vsyncadd [#allocation3], 4294967040 }
  0x36   :  { %298 = dma.done.wait [#allocation6], 768  }
  0x37   :  { %299 = vsyncadd [#allocation6], 4294966528  ;;  %v309_v0 = vmov 0.0   ;;  %vm310_vm0 = vmmov 0   ;;  %v204_v1 = vld [vmem:[#allocation5] sm:$0xff]   ;;  %v205_v2 = vld [vmem:[#allocation5 + $0x8] sm:$0xff]  }
  0x38   :  { %182 = vmatprep.subr.bf16.mxu0 %v309_v0  ;;  %190 = vmatprep.mubr.msk.bf16.mxu0 %vm310_vm0, %v309_v0  ;;  %v206_v3 = vld [vmem:[#allocation5 + $0x10] sm:$0xff]   ;;  %v207_v4 = vld [vmem:[#allocation5 + $0x18] sm:$0xff]   ;;  %vm102_vm1 = vcmask 523264   ;;  %v147_v10 = vld [vmem:[#allocation7] sm:$0xff]  ;;  %s311_s28 = smov [#allocation8]  }
  0x39   :  { %183 = vmatpush3.bf16.msra.mxu0 %v204_v1  ;;  %v60_v5 = vld [vmem:[#allocation2] sm:$0xff]  ;;  %v61_v6 = vld [vmem:[#allocation2 + $0x8] sm:$0xff]  ;;  %v148_v14 = vld [vmem:[#allocation7 + $0x8] sm:$0xff]  ;;  %s158_s29 = sshll.u32 %s311_s28, 4  ;;  %s159_s29 = int_to_ptr.vmem [resolvable:$true] %s158_s29 }
  0x3a   :  { %184 = vmatprep.subr.bf16.mxu0 %v309_v0  ;;  %v62_v7 = vpack.c.bf16 %v61_v6, %v60_v5  ;;  %v171_v8 = vld [vmem:[%s402_s2] ss:$0 sm:$0xff]  ;;  %s274_s30 = scalar_lea.vmem %s159_s29, 256  ;;  %p279_p11 = scmp.lt.s32.totalorder %s159_s29, %s159_s29 }
  0x3b   :  { %p275_p10 = scmp.ne.s32.totalorder %s159_s29, %s274_s30  ;;  %p280_p12 = scmp.lt.s32.totalorder %s274_s30, %s274_s30 }
  0x3d   :  { %185 = vmatpush3.bf16.msra.mxu0 %v205_v2  ;;  %p281_p13 = por %p280_p12, %p279_p11 }
  0x3e   :  { %186 = vmatprep.subr.bf16.mxu0 %v309_v0 }
  0x3f   :  { %p282_p0 = pnand %p281_p13, %p275_p10 }
  0x41   :  { %187 = vmatpush3.bf16.msra.mxu0 %v206_v3 }
  0x42   :  { %188 = vmatprep.subr.bf16.mxu0 %v309_v0 }
  0x45   :  { %189 = vmatpush3.bf16.msra.mxu0 %v207_v4 }
  0x48   :  { %191 = vmatmul.mubr.msk.bf16.vlgmr.msra.gmra.mrb[0].mxu0 %vm102_vm1, %v62_v7 }
 0x11b   :  { %v140_v9 = vpop.f32.mrb[0].mxu0 }
 0x11c   :  { %v141_v11 = vadd.f32 %v171_v8, %v140_v9  ;;  %v192_v12 = vpop.f32.mrb[1].mxu0 }
 0x11d   :  { %v143_v13 = vpop.f32.mrb[2].mxu0 }
 0x11e   :  { %v149_v15 = vadd.f32 %v147_v10, %v141_v11  ;;  %v144_v16 = vadd.f32 %v171_v8, %v143_v13  ;;  %v193_v17 = vpop.f32.mrb[3].mxu0 }
 0x120   :  { %151 = vst.msk [vmem:[#allocation8] sm:$0xff] %vm102_vm1, %v149_v15  ;;  %v150_v18 = vadd.f32 %v148_v14, %v144_v16 }
 0x122   :  { %152 = vst.msk [vmem:[#allocation8 + $0x8] sm:$0xff] %vm102_vm1, %v150_v18 }
 0x123   :  { %285 = shalt.err (!%p282_p0)
}
 0x124   :  { %s286_s6 = scalar_lea.hbm %s404_s4, 256 }
 0x125   :  { %p287_p1 = scmp.ne.s32.totalorder %s404_s4, %s286_s6  ;;  %p290_p2 = scmp.lt.u32.totalorder %s286_s6, %s404_s4 }
 0x127   :  { %p292_p3 = pnand %p290_p2, %p287_p1 }
 0x129   :  { %295 = shalt.err (!%p292_p3)
}
 0x12a   :  { %164 = dma.vmem_to_hbm [thread:$0]  %s159_s29, 256, %s404_s4, [#allocation4], %s306_s1, %s306_s1, %s307_s13  }
 0x12b   :  { %300 = dma.done.wait [#allocation4], 256  }
 0x12c   :  { %301 = vsyncadd [#allocation4], 4294967040 }
 0x12d   :  { %168 = vsyncpa [#allocation3], 1 }
 0x12e   :  { %169 = vsyncpa [#allocation6], 1 }
 0x12f   :  { %170 = vsyncpa [#allocation4], 1 }

</bundles_post_ra>
